<compile_context>
chip_gen: v6e
topology: v6e:2x2x1
jax: 0.10.0
libtpu: 0.0.40
codegen_flags: <defaults>
</compile_context>

<pallas_src>
import functools

import jax
import jax.numpy as jnp
from jax.experimental import pallas as pl
from jax.experimental.pallas import tpu as pltpu


def _round_up(x, m):
    return ((x + m - 1) // m) * m


def _film_mlp_kernel(cond_ref, wp_ref, bp_ref, out_ref, *,
                     cond_nc, fc_nc, norm_nc, row1, row2):
    """3-layer MLP: relu(L1) -> relu(L2) -> L3, one combined output tile."""
    out_nc = 2 * norm_nc

    # Static, 16-row-aligned slices of the packed bf16 weight slab (views).
    w1 = wp_ref[0:cond_nc, 0:fc_nc]                       # [cond_nc, fc_nc]
    w2 = wp_ref[row1:row1 + fc_nc, 0:fc_nc]               # [fc_nc, fc_nc]
    w3 = wp_ref[row1 + row2:row1 + row2 + fc_nc, 0:out_nc]  # [fc_nc, 2*norm_nc]
    b1 = bp_ref[0:1, 0:fc_nc]                             # f32
    b2 = bp_ref[1:2, 0:fc_nc]                             # f32
    b3 = bp_ref[2:3, 0:out_nc]                            # f32

    # In-kernel cast of cond (free VPU work under the input DMA).
    x = cond_ref[...].astype(jnp.bfloat16)

    # Linear 1 + ReLU (bf16 inputs, f32 accumulation on the MXU).
    h = jnp.dot(x, w1, preferred_element_type=jnp.float32) + b1
    h = jnp.maximum(h, 0.0)
    # Linear 2 + ReLU.
    h = jnp.dot(h.astype(jnp.bfloat16), w2,
                preferred_element_type=jnp.float32) + b2
    h = jnp.maximum(h, 0.0)
    # Final transform (no activation) -> single lane-dense store.
    out = jnp.dot(h.astype(jnp.bfloat16), w3,
                  preferred_element_type=jnp.float32) + b3
    out_ref[...] = out.astype(out_ref.dtype)


def pack_params(params, cond_nc, fc_nc, norm_nc):
    """Pack (w1,b1,w2,b2,w3,b3) into one bf16 weight slab + one f32 bias slab.

    Each weight section's row count is rounded up to a multiple of 16 (bf16
    sublane tile) so the kernel's static slices are tile-aligned views.
    Done once at load time, not per forward call.
    Returns (weight_slab, bias_slab, (row1, row2)) where row1/row2 are the
    padded row offsets the kernel must use.
    """
    w1, b1, w2, b2, w3, b3 = params
    out_nc = 2 * norm_nc
    width = max(fc_nc, out_nc)
    row1 = _round_up(cond_nc, 16)
    row2 = _round_up(fc_nc, 16)

    def pad_block(a, rows):
        return jnp.pad(a, ((0, rows - a.shape[0]), (0, width - a.shape[1])))

    wp = jnp.concatenate(
        [pad_block(w1, row1), pad_block(w2, row2),
         pad_block(w3, w3.shape[0])],
        axis=0).astype(jnp.bfloat16)                 # [row1 + row2 + fc_nc, width]
    bp = jnp.concatenate(
        [pad_block(b1, 1), pad_block(b2, 1), pad_block(b3, 1)],
        axis=0).astype(jnp.float32)                  # [3, width]
    return wp, bp, (row1, row2)


def _num_tensorcores_per_chip():
    """2 TensorCores on v7x, 1 on v5e/v6e (and anything unknown)."""
    try:
        kind = jax.devices()[0].device_kind.lower()
    except Exception:  # pragma: no cover - defensive
        return 1
    return 2 if ("v7" in kind or "7x" in kind) else 1


def _pick_block_b(B, cond_nc, norm_nc, num_cores):
    """Grid sizing: 1 step on single-TC chips, 2 parallel steps on v7x,
    with a VMEM guard for the v7x 32 MiB scoped default."""
    block_b = B
    # Exactly 2 parallel steps on v7x, but only if the half-blocks stay
    # sublane (8) aligned.
    if num_cores >= 2 and B % 16 == 0:
        block_b = B // 2
    # VMEM guard: double-buffered f32 cond + f32 combined output per step
    # (weight/bias slabs are tiny and single-buffered).
    per_row_bytes = 2 * 4 * (cond_nc + 2 * norm_nc)
    vmem_budget = 24 << 20
    while block_b * per_row_bytes > vmem_budget and block_b % 16 == 0:
        block_b //= 2
    return block_b


def film_generator_forward(cond, packed_params, *, cond_nc, fc_nc, norm_nc):
    """Pallas implementation of film_generator(fc=3).forward."""
    wp, bp, (row1, row2) = packed_params
    B = cond.shape[0]
    out_nc = 2 * norm_nc

    num_cores = _num_tensorcores_per_chip()
    block_b = _pick_block_b(B, cond_nc, norm_nc, num_cores)
    grid = (B // block_b,)

    kernel = functools.partial(
        _film_mlp_kernel, cond_nc=cond_nc, fc_nc=fc_nc, norm_nc=norm_nc,
        row1=row1, row2=row2)

    param = pl.pallas_call(
        kernel,
        out_shape=jax.ShapeDtypeStruct((B, out_nc), jnp.float32),
        grid_spec=pltpu.PrefetchScalarGridSpec(
            num_scalar_prefetch=0,
            grid=grid,
            in_specs=[
                pl.BlockSpec((block_b, cond_nc), lambda i: (i, 0)),
                # Grid-invariant parameter slabs: constant index_map,
                # single-buffered.
                pl.BlockSpec(wp.shape, lambda i: (0, 0),
                             pipeline_mode=pl.Buffered(1)),
                pl.BlockSpec(bp.shape, lambda i: (0, 0),
                             pipeline_mode=pl.Buffered(1)),
            ],
            out_specs=pl.BlockSpec((block_b, out_nc), lambda i: (i, 0)),
        ),
        compiler_params=pltpu.CompilerParams(
            dimension_semantics=("parallel",)),
    )(cond, wp, bp)

    # param.chunk(2, dim=1) then unsqueeze(2).unsqueeze(3): wrapper-side
    # slice + reshape (fuses into the downstream consumer).
    factor = param[:, :norm_nc].reshape(B, norm_nc, 1, 1)
    bias = param[:, norm_nc:].reshape(B, norm_nc, 1, 1)
    return factor, bias


def init_params(key, cond_nc, fc_nc, norm_nc):
    """Deterministic init mimicking nn.Linear (uniform +/- 1/sqrt(fan_in)),
    with the final bias set to [1]*norm_nc + [0]*norm_nc as in __init__."""
    def linear_init(k, fan_in, fan_out):
        kw, kb = jax.random.split(k)
        bound = 1.0 / jnp.sqrt(float(fan_in))
        w = jax.random.uniform(kw, (fan_in, fan_out), jnp.float32, -bound, bound)
        b = jax.random.uniform(kb, (1, fan_out), jnp.float32, -bound, bound)
        return w, b

    k1, k2, k3 = jax.random.split(key, 3)
    w1, b1 = linear_init(k1, cond_nc, fc_nc)       # transform1
    w2, b2 = linear_init(k2, fc_nc, fc_nc)         # transform2
    w3, _ = linear_init(k3, fc_nc, 2 * norm_nc)    # transform
    b3 = jnp.concatenate(
        [jnp.ones((1, norm_nc), jnp.float32),
         jnp.zeros((1, norm_nc), jnp.float32)], axis=1)
    return (w1, b1, w2, b2, w3, b3)


def reference_forward(cond, params, norm_nc):
    """Pure-JAX reference with the same bf16-input / f32-accumulate recipe."""
    w1, b1, w2, b2, w3, b3 = params
    bf, f32 = jnp.bfloat16, jnp.float32
    h = jnp.dot(cond.astype(bf), w1.astype(bf), preferred_element_type=f32) + b1
    h = jnp.maximum(h, 0.0)
    h = jnp.dot(h.astype(bf), w2.astype(bf), preferred_element_type=f32) + b2
    h = jnp.maximum(h, 0.0)
    param = jnp.dot(h.astype(bf), w3.astype(bf), preferred_element_type=f32) + b3
    B = cond.shape[0]
    return (param[:, :norm_nc].reshape(B, norm_nc, 1, 1),
            param[:, norm_nc:].reshape(B, norm_nc, 1, 1))


if __name__ == "__main__":
    # Small shapes consistent with the module: cond is [B, cond_nc].
    B, cond_nc, fc_nc, norm_nc = 2, 32, 64, 4

    key = jax.random.PRNGKey(0)
    k_cond, k_params = jax.random.split(key)
    cond = jax.random.normal(k_cond, (B, cond_nc), jnp.float32)
    params = init_params(k_params, cond_nc, fc_nc, norm_nc)
    packed = pack_params(params, cond_nc, fc_nc, norm_nc)

    factor, bias = film_generator_forward(
        cond, packed, cond_nc=cond_nc, fc_nc=fc_nc, norm_nc=norm_nc)
    factor, bias = jax.block_until_ready((factor, bias))

    # Sanity check against the pure-JAX reference (same bf16/f32 recipe).
    f_ref, b_ref = reference_forward(cond, params, norm_nc)
    assert factor.shape == (B, norm_nc, 1, 1) and bias.shape == (B, norm_nc, 1, 1)
    assert jnp.allclose(factor, f_ref, atol=1e-3, rtol=1e-3)
    assert jnp.allclose(bias, b_ref, atol=1e-3, rtol=1e-3)

    print("KERNEL_OK")
</pallas_src>

<mosaic_0001>
module attributes {stable_mosaic.version = 11 : i64} {
  func.func @_film_mlp_kernel(%arg0: i32, %arg1: memref<2x32xf32, #tpu.memory_space<vmem>>, %arg2: memref<160x64xbf16, #tpu.memory_space<vmem>>, %arg3: memref<3x64xf32, #tpu.memory_space<vmem>>, %arg4: memref<2x8xf32, #tpu.memory_space<vmem>>) attributes {dimension_semantics = [#tpu.dimension_semantics<parallel>], iteration_bounds = array<i64: 1>, scalar_prefetch = 0 : i64, scratch_operands = 0 : i64, tpu.core_type = #tpu.core_type<tc>, window_params = [{transform_indices = @transform_0, window_bounds = array<i64: 2, 32>}, {pipeline_mode = #tpu.pipeline_mode<synchronous>, transform_indices = @transform_1, window_bounds = array<i64: 160, 64>}, {pipeline_mode = #tpu.pipeline_mode<synchronous>, transform_indices = @transform_2, window_bounds = array<i64: 3, 64>}, {transform_indices = @transform_3, window_bounds = array<i64: 2, 8>}]} {
    %c0 = arith.constant 0 : index
    %c0_0 = arith.constant 0 : index
    %0 = vector.load %arg2[%c0, %c0_0] : memref<160x64xbf16, #tpu.memory_space<vmem>>, vector<32x64xbf16>
    %c32 = arith.constant 32 : index
    %c0_1 = arith.constant 0 : index
    %1 = vector.load %arg2[%c32, %c0_1] : memref<160x64xbf16, #tpu.memory_space<vmem>>, vector<64x64xbf16>
    %c96 = arith.constant 96 : index
    %c0_2 = arith.constant 0 : index
    %2 = vector.load %arg2[%c96, %c0_2] : memref<160x64xbf16, #tpu.memory_space<vmem>>, vector<64x8xbf16>
    %c0_3 = arith.constant 0 : index
    %c0_4 = arith.constant 0 : index
    %3 = vector.load %arg3[%c0_3, %c0_4] : memref<3x64xf32, #tpu.memory_space<vmem>>, vector<1x64xf32>
    %c1 = arith.constant 1 : index
    %c0_5 = arith.constant 0 : index
    %4 = vector.load %arg3[%c1, %c0_5] : memref<3x64xf32, #tpu.memory_space<vmem>>, vector<1x64xf32>
    %c2 = arith.constant 2 : index
    %c0_6 = arith.constant 0 : index
    %5 = vector.load %arg3[%c2, %c0_6] : memref<3x64xf32, #tpu.memory_space<vmem>>, vector<1x8xf32>
    %c0_7 = arith.constant 0 : index
    %c0_8 = arith.constant 0 : index
    %6 = vector.load %arg1[%c0_7, %c0_8] : memref<2x32xf32, #tpu.memory_space<vmem>>, vector<2x32xf32>
    %7 = arith.truncf %6 : vector<2x32xf32> to vector<2x32xbf16>
    %cst = arith.constant dense<0.000000e+00> : vector<2x64xf32>
    %8 = tpu.matmul %7, %0, %cst {dimension_numbers = #tpu.dot_dimension_numbers<[1], [0], [0], [1], [0, 0, 1, 1], [], []>} : vector<2x32xbf16>, vector<32x64xbf16>, vector<2x64xf32> -> vector<2x64xf32>
    %9 = vector.broadcast %3 : vector<1x64xf32> to vector<2x64xf32>
    %10 = arith.addf %8, %9 : vector<2x64xf32>
    %cst_9 = arith.constant 0.000000e+00 : f32
    %11 = vector.broadcast %cst_9 : f32 to vector<2x64xf32>
    %12 = arith.maximumf %10, %11 : vector<2x64xf32>
    %13 = arith.truncf %12 : vector<2x64xf32> to vector<2x64xbf16>
    %cst_10 = arith.constant dense<0.000000e+00> : vector<2x64xf32>
    %14 = tpu.matmul %13, %1, %cst_10 {dimension_numbers = #tpu.dot_dimension_numbers<[1], [0], [0], [1], [0, 0, 1, 1], [], []>} : vector<2x64xbf16>, vector<64x64xbf16>, vector<2x64xf32> -> vector<2x64xf32>
    %15 = vector.broadcast %4 : vector<1x64xf32> to vector<2x64xf32>
    %16 = arith.addf %14, %15 : vector<2x64xf32>
    %cst_11 = arith.constant 0.000000e+00 : f32
    %17 = vector.broadcast %cst_11 : f32 to vector<2x64xf32>
    %18 = arith.maximumf %16, %17 : vector<2x64xf32>
    %19 = arith.truncf %18 : vector<2x64xf32> to vector<2x64xbf16>
    %cst_12 = arith.constant dense<0.000000e+00> : vector<2x8xf32>
    %20 = tpu.matmul %19, %2, %cst_12 {dimension_numbers = #tpu.dot_dimension_numbers<[1], [0], [0], [1], [0, 0, 1, 1], [], []>} : vector<2x64xbf16>, vector<64x8xbf16>, vector<2x8xf32> -> vector<2x8xf32>
    %21 = vector.broadcast %5 : vector<1x8xf32> to vector<2x8xf32>
    %22 = arith.addf %20, %21 : vector<2x8xf32>
    %c0_13 = arith.constant 0 : index
    %c0_14 = arith.constant 0 : index
    %23 = vector.load %arg4[%c0_13, %c0_14] : memref<2x8xf32, #tpu.memory_space<vmem>>, vector<2x8xf32>
    tpu.vector_store %arg4[%c0_13, %c0_14], %22 {strides = array<i32>} : memref<2x8xf32, #tpu.memory_space<vmem>>, vector<2x8xf32>,
    return
  }
  func.func @transform_0(%arg0: i32) -> (i32, i32) {
    %c0_i32 = arith.constant 0 : i32
    %c0_i32_0 = arith.constant 0 : i32
    return %arg0, %c0_i32 : i32, i32
  }
  func.func @transform_1(%arg0: i32) -> (i32, i32) {
    %c0_i32 = arith.constant 0 : i32
    %c0_i32_0 = arith.constant 0 : i32
    %c0_i32_1 = arith.constant 0 : i32
    return %c0_i32, %c0_i32_0 : i32, i32
  }
  func.func @transform_2(%arg0: i32) -> (i32, i32) {
    %c0_i32 = arith.constant 0 : i32
    %c0_i32_0 = arith.constant 0 : i32
    %c0_i32_1 = arith.constant 0 : i32
    return %c0_i32, %c0_i32_0 : i32, i32
  }
  func.func @transform_3(%arg0: i32) -> (i32, i32) {
    %c0_i32 = arith.constant 0 : i32
    %c0_i32_0 = arith.constant 0 : i32
    return %arg0, %c0_i32 : i32, i32
  }
}

</mosaic_0001>

<bundles_post_ra>
// kernel: tpu_custom_call.1
= control target key start
LH: loop header
LB: loop body
LE: loop exit
PB: predicated region body
PF: predicated region fallthrough
CT: control target
= control target key end

     0   :  { %v360_v1 = vmov 0.0   ;;  %vm361_vm0 = vmmov 0   ;;  %vm57_vm1 = vcmask 261120   ;;  %s433_s0 = inlined_call_operand.vmem [shape: f32[2,32], index: 0, kind: input, shape index: {}]   ;;  %s434_s1 = inlined_call_operand.vmem [shape: bf16[160,64], index: 1, kind: input, shape index: {}]   ;;  %s435_s2 = inlined_call_operand.vmem [shape: f32[3,64], index: 2, kind: input, shape index: {}]   ;;  %s436_s3 = inlined_call_operand.hbm [shape: f32[2,8], index: 3, kind: output, shape index: {}]  }
   0x1   :  { %v328_v0 = vld [vmem:[%s434_s1 + $0x8] sm:$0xff]   ;;  %293 = vmatprep.subr.bf16.mxu0 %v360_v1  ;;  %v329_v2 = vld [vmem:[%s434_s1] sm:$0xff]   ;;  %301 = vmatprep.subr.bf16.mxu1 %v360_v1 }
   0x2   :  { %294 = vmatpush3.bf16.msra.mxu0 %v328_v0  ;;  %297 = vmatprep.mubr.msk.bf16.mxu0 %vm361_vm0, %v360_v1  ;;  %v39_v3 = vld [vmem:[%s433_s0] sm:$0x3]  ;;  %v330_v4 = vld [vmem:[%s434_s1 + $0x28] sm:$0xff]  }
   0x3   :  { %295 = vmatprep.subr.bf16.mxu0 %v360_v1  ;;  %309 = vmatprep.mubr.msk.bf16.mxu1 %vm361_vm0, %v360_v1  ;;  %v331_v5 = vld [vmem:[%s434_s1 + $0x20] sm:$0xff]   ;;  %v40_v6 = vpack.c.bf16 %v39_v3, %v39_v3 }
   0x4   :  { %302 = vmatpush3.bf16.msra.mxu1 %v330_v4 }
   0x5   :  { %303 = vmatprep.subr.bf16.mxu1 %v360_v1 }
   0x6   :  { %296 = vmatpush3.bf16.msra.mxu0 %v329_v2 }
   0x7   :  { %313 = vmatprep.subr.bf16.mxu0 %v360_v1 }
   0x8   :  { %304 = vmatpush3.bf16.msra.mxu1 %v331_v5 }
   0x9   :  { %8 = vsyncpa [#allocation3], 0  ;;  %298 = vmatmul.mubr.msk.bf16.vlgmr.msra.gmra.mxu0 %vm57_vm1, %v40_v6  ;;  %305 = vmatprep.subr.bf16.mxu1 %v360_v1  ;;  %v332_v7 = vld [vmem:[%s434_s1 + $0x18] sm:$0xff]   ;;  %v333_v8 = vld [vmem:[%s434_s1 + $0x10] sm:$0xff]   ;;  %vm131_vm2 = vcmask 523264   ;;  %s362_s12 = smov [#allocation2]  }
   0xa   :  { %321 = vmatprep.mubr.msk.bf16.mxu0 %vm361_vm0, %v360_v1  ;;  %v334_v9 = vld [vmem:[%s434_s1 + $0x48] sm:$0xff]   ;;  %v335_v10 = vld [vmem:[%s434_s1 + $0x40] sm:$0xff]   ;;  %v336_v19 = vld [vmem:[%s434_s1 + $0x38] sm:$0xff]   ;;  %vm248_vm3 = vcmask 58368  }
   0xb   :  { %314 = vmatpush3.bf16.msra.mxu0 %v334_v9  ;;  %v264_v11 = vld [vmem:[%s435_s2] ss:$0 sm:$0xff]  ;;  %v337_v20 = vld [vmem:[%s434_s1 + $0x30] sm:$0xff]   ;;  %v268_v21 = vld [vmem:[%s435_s2 + $0x1] ss:$0 sm:$0xff]  ;;  %s256_s1 = sshll.u32 %s362_s12, 4  ;;  %s257_s1 = int_to_ptr.vmem [resolvable:$true] %s256_s1 }
   0xc   :  { %306 = vmatpush3.bf16.msra.mxu1 %v332_v7  ;;  %315 = vmatprep.subr.bf16.mxu0 %v360_v1  ;;  %v274_v29 = vld [vmem:[%s435_s2 + $0x2] ss:$0 sm:$0xff]  ;;  %s338_s13 = scalar_lea.vmem %s257_s1, 32  ;;  %p343_p1 = scmp.lt.s32.totalorder %s257_s1, %s257_s1 }
   0xd   :  { %307 = vmatprep.subr.bf16.mxu1 %v360_v1  ;;  %p339_p0 = scmp.ne.s32.totalorder %s257_s1, %s338_s13  ;;  %p344_p2 = scmp.lt.s32.totalorder %s338_s13, %s338_s13 }
   0xf   :  { %316 = vmatpush3.bf16.msra.mxu0 %v335_v10  ;;  %p345_p3 = por %p344_p2, %p343_p1 }
  0x10   :  { %308 = vmatpush3.bf16.msra.mxu1 %v333_v8  ;;  %317 = vmatprep.subr.bf16.mxu0 %v360_v1 }
  0x11   :  { %p346_p4 = pnand %p345_p3, %p339_p0 }
  0x13   :  { %318 = vmatpush3.bf16.msra.mxu0 %v336_v19 }
  0x14   :  { %319 = vmatprep.subr.bf16.mxu0 %v360_v1 }
  0x17   :  { %320 = vmatpush3.bf16.msra.mxu0 %v337_v20 }
  0xc9   :  { %v95_v12 = vpop.f32.mrf.mxu0 }
  0xca   :  { %v96_v13 = vadd.f32 %v264_v11, %v95_v12 }
  0xcb   :  { %v299_v14 = vpop.f32.mrf.mxu0 }
  0xcc   :  { %v101_v15 = vmax.f32 %v96_v13, 0.0 }
  0xcd   :  { %v98_v16 = vpop.f32.mrf.mxu0 }
  0xce   :  { %v102_v17 = vpack.c.bf16 %v101_v15, %v101_v15 }
  0xcf   :  { %v300_v18 = vpop.f32.mrf.mxu0 }
  0xd0   :  { %310 = vmatmul.mubr.msk.bf16.vlgmr.msra.gmra.mxu1 %vm131_vm2, %v102_v17 }
 0x190   :  { %v169_v22 = vpop.f32.mrf.mxu1 }
 0x191   :  { %v170_v23 = vadd.f32 %v268_v21, %v169_v22 }
 0x192   :  { %v311_v24 = vpop.f32.mrf.mxu1 }
 0x193   :  { %v175_v25 = vmax.f32 %v170_v23, 0.0 }
 0x194   :  { %v172_v26 = vpop.f32.mrf.mxu1 }
 0x195   :  { %v176_v27 = vpack.c.bf16 %v175_v25, %v175_v25 }
 0x196   :  { %v312_v28 = vpop.f32.mrf.mxu1 }
 0x197   :  { %322 = vmatmul.mubr.msk.bf16.vlgmr.msra.gmra.mxu0 %vm131_vm2, %v176_v27 }
 0x257   :  { %v242_v30 = vpop.f32.mrf.mxu0 }
 0x258   :  { %v243_v31 = vadd.f32 %v274_v29, %v242_v30 }
 0x259   :  { %v323_v32 = vpop.f32.mrf.mxu0 }
 0x25a   :  { %249 = vst.msk [vmem:[#allocation2] sm:$0x3] %vm248_vm3, %v243_v31 }
 0x25b   :  { %v245_v33 = vpop.f32.mrf.mxu0 }
 0x25c   :  { %349 = shalt.err (!%p346_p4)
}
 0x25d   :  { %259 = dma.vmem_to_hbm [thread:$0]  %s257_s1, 32, %s436_s3, [#allocation3]   ;;  %v324_v34 = vpop.f32.mrf.mxu0 }
 0x25e   :  { %358 = dma.done.wait [#allocation3], 32  }
 0x25f   :  { %359 = vsyncadd [#allocation3], 4294967264 }
 0x260   :  { %263 = vsyncpa [#allocation3], 1 }

</bundles_post_ra>
